<compile_context>
chip_gen: v5e
topology: v5e:2x2
jax: 0.10.0
libtpu: 0.0.40
codegen_flags: <defaults>
</compile_context>

<pallas_src>
import functools

import jax
import jax.numpy as jnp
from jax.experimental import pallas as pl
from jax.experimental.pallas import tpu as pltpu


def _ar_kernel(x_ref, w1_ref, b1_ref, w2_ref, b2_ref, o_ref, *, kernel_size,
               dilation):
    """One grid step = `batch_block` batch elements, fully fused.

    x_ref : (1, C_in, W)       W = batch_block * L, batch folded onto lanes
    w1_ref: (K, H, C_in)       per-tap conv1 weights
    b1_ref: (H, 1)  f32
    w2_ref: (K, C_in, H)       per-tap conv2 weights
    b2_ref: (C_in, 1) f32
    o_ref : (1, C_in, W) f32   valid prefix [:W - 2*(K-1)*d] is written
    """
    K, d = kernel_size, dilation
    W = x_ref.shape[-1]
    w1out = W - d * (K - 1)
    w2out = W - 2 * d * (K - 1)

    xf = x_ref[0]                                     # (C_in, W)

    # ---- conv1: K accumulating matmuls over the dilated taps (f32 acc) ------
    h = jnp.dot(w1_ref[0], xf[:, 0:w1out],
                preferred_element_type=jnp.float32)
    for k in range(1, K):                             # static unroll
        h += jnp.dot(w1_ref[k], xf[:, k * d:k * d + w1out],
                     preferred_element_type=jnp.float32)
    h = jnp.maximum(h + b1_ref[...], 0.0)             # bias + ReLU (f32 VPU)
    h = h.astype(w2_ref.dtype)                        # bf16 operand for MXU

    # ---- conv2: K accumulating matmuls (contraction = H each, f32 acc) ------
    y = jnp.dot(w2_ref[0], h[:, 0:w2out],
                preferred_element_type=jnp.float32)
    for k in range(1, K):
        y += jnp.dot(w2_ref[k], h[:, k * d:k * d + w2out],
                     preferred_element_type=jnp.float32)
    y = y + b2_ref[...]

    # ---- lane-dense store of the valid slab (tail lanes never read) ---------
    o_ref[0, :, 0:w2out] = y.astype(o_ref.dtype)


def autoregressive_forward(x, w1, b1, w2, b2, *, kernel_size, dilation,
                           batch_block=None, compute_dtype=jnp.bfloat16):
    """Pallas implementation of AutoregressiveModel.forward.

    x : (N, C_in, L);  w1: (H, C_in, K), b1: (H,);  w2: (C_in, H, K), b2: (C_in,)
    returns (N, C_in, L - 2*dilation*(K-1)) float32
    """
    n, c_in, length = x.shape
    hidden = w1.shape[0]
    K, d = kernel_size, dilation
    l1 = length - d * (K - 1)
    l2 = l1 - d * (K - 1)
    assert l2 > 0, "sequence too short for two dilated VALID convs"

    if batch_block is None:
        # Keep W = batch_block*L small enough that h/y live in vregs (no
        # spills), and aim for grid >= 2 so both v7x TensorCores get work.
        lane_budget = 2048
        batch_block = max(1, min(n, lane_budget // max(length, 1)))
        if n >= 2:
            batch_block = min(batch_block, pl.cdiv(n, 2))
        batch_block = max(1, batch_block)
    # TODO(synk): for very long L (> ~2-4K lanes per step), add a length grid
    # axis with a 2*d*(K-1) halo so intermediates stay in vregs and blocks stay
    # under v7x's 64 MiB VMEM.

    grid = pl.cdiv(n, batch_block)
    n_pad = grid * batch_block
    W = batch_block * length
    w1out = W - d * (K - 1)
    w2out = W - 2 * d * (K - 1)

    # --- layout plumbing (XLA side): fold batch onto the lane axis -----------
    x_p = x if n_pad == n else jnp.pad(x, ((0, n_pad - n), (0, 0), (0, 0)))
    xf = (x_p.reshape(grid, batch_block, c_in, length)
             .transpose(0, 2, 1, 3)
             .reshape(grid, c_in, W)
             .astype(compute_dtype))

    # Per-tap weights: (K, out, in)
    w1k = jnp.transpose(w1, (2, 0, 1)).astype(compute_dtype)   # (K, H, C_in)
    w2k = jnp.transpose(w2, (2, 0, 1)).astype(compute_dtype)   # (K, C_in, H)
    b1c = b1.reshape(hidden, 1).astype(jnp.float32)
    b2c = b2.reshape(c_in, 1).astype(jnp.float32)

    kernel = functools.partial(_ar_kernel, kernel_size=K, dilation=d)

    op_bytes = jnp.dtype(compute_dtype).itemsize
    flops = 2 * grid * (hidden * K * c_in * w1out + c_in * K * hidden * w2out)
    bytes_accessed = (xf.size * op_bytes + w1k.size * op_bytes
                      + w2k.size * op_bytes + b1c.size * 4 + b2c.size * 4
                      + grid * c_in * W * 4)
    # Per-step working set (x block + out block double-buffered + weights).
    vmem_need = 2 * (c_in * W * op_bytes + c_in * W * 4) \
        + 2 * (w1k.size + w2k.size) * op_bytes + (1 << 20)
    vmem_limit = int(min(max(vmem_need, 32 * 1024 * 1024), 60 * 1024 * 1024))

    out = pl.pallas_call(
        kernel,
        out_shape=jax.ShapeDtypeStruct((grid, c_in, W), jnp.float32),
        grid_spec=pltpu.PrefetchScalarGridSpec(
            num_scalar_prefetch=0,
            grid=(grid,),
            in_specs=[
                pl.BlockSpec((1, c_in, W), lambda i: (i, 0, 0)),          # x
                pl.BlockSpec((K, hidden, c_in), lambda i: (0, 0, 0)),     # w1
                pl.BlockSpec((hidden, 1), lambda i: (0, 0)),              # b1
                pl.BlockSpec((K, c_in, hidden), lambda i: (0, 0, 0)),     # w2
                pl.BlockSpec((c_in, 1), lambda i: (0, 0)),                # b2
            ],
            out_specs=pl.BlockSpec((1, c_in, W), lambda i: (i, 0, 0)),
        ),
        compiler_params=pltpu.CompilerParams(
            dimension_semantics=("parallel",),
            vmem_limit_bytes=vmem_limit),
        cost_estimate=pl.CostEstimate(flops=flops, transcendentals=0,
                                      bytes_accessed=int(bytes_accessed)),
    )(xf, w1k, b1c, w2k, b2c)

    # Lane slab -> (N, C_in, l2): lane j = b*L + t maps to (b, t); keep t < l2.
    out = (out.reshape(grid, c_in, batch_block, length)
              .transpose(0, 2, 1, 3)
              .reshape(n_pad, c_in, length))
    return out[:n, :, :l2]


def _reference(x, w1, b1, w2, b2, *, kernel_size, dilation):
    """Pure-JAX reference (lax dilated conv) matching nn.Conv1d semantics."""
    def conv1d(inp, w, b):
        out = jax.lax.conv_general_dilated(
            inp, w, window_strides=(1,), padding="VALID",
            rhs_dilation=(dilation,),
            dimension_numbers=("NCH", "OIH", "NCH"))
        return out + b[None, :, None]
    h = jax.nn.relu(conv1d(x, w1, b1))
    return conv1d(h, w2, b2)


if __name__ == "__main__":
    # input_dim=4, hidden_dim=32, kernel_size=3, dilation_rate=2, L=16, N=2
    input_dim, hidden_dim, kernel_size, dilation = 4, 32, 3, 2
    batch, length = 2, 16

    key = jax.random.PRNGKey(0)
    kx, k1, kb1, k2, kb2 = jax.random.split(key, 5)

    x = jax.random.normal(kx, (batch, input_dim, length), dtype=jnp.float32)
    w1 = jax.random.normal(k1, (hidden_dim, input_dim, kernel_size),
                           dtype=jnp.float32) * 0.1
    b1 = jax.random.normal(kb1, (hidden_dim,), dtype=jnp.float32) * 0.1
    w2 = jax.random.normal(k2, (input_dim, hidden_dim, kernel_size),
                           dtype=jnp.float32) * 0.1
    b2 = jax.random.normal(kb2, (input_dim,), dtype=jnp.float32) * 0.1

    ref = _reference(x, w1, b1, w2, b2,
                     kernel_size=kernel_size, dilation=dilation)

    # f32 operand path: bit-tight vs. reference.
    out_f32 = autoregressive_forward(x, w1, b1, w2, b2,
                                     kernel_size=kernel_size,
                                     dilation=dilation,
                                     compute_dtype=jnp.float32)
    out_f32 = jax.block_until_ready(out_f32)
    assert out_f32.shape == ref.shape, (out_f32.shape, ref.shape)
    assert jnp.allclose(out_f32, ref, atol=1e-4, rtol=1e-4), \
        "f32 path mismatch vs reference"

    # default bf16-operand path (f32 accumulation / epilogue): loose tolerance,
    # the inter-conv activation is rounded to bf16.
    out_bf16 = autoregressive_forward(x, w1, b1, w2, b2,
                                      kernel_size=kernel_size,
                                      dilation=dilation)
    out_bf16 = jax.block_until_ready(out_bf16)
    assert out_bf16.shape == ref.shape, (out_bf16.shape, ref.shape)
    assert jnp.allclose(out_bf16, ref, atol=5e-2, rtol=5e-2), \
        "bf16 path mismatch vs reference"

    print("KERNEL_OK")
</pallas_src>

<mosaic_0001>
module attributes {stable_mosaic.version = 11 : i64} {
  func.func @_ar_kernel(%arg0: i32, %arg1: memref<1x4x16xf32, #tpu.memory_space<vmem>>, %arg2: memref<3x32x4xf32, #tpu.memory_space<vmem>>, %arg3: memref<32x1xf32, #tpu.memory_space<vmem>>, %arg4: memref<3x4x32xf32, #tpu.memory_space<vmem>>, %arg5: memref<4x1xf32, #tpu.memory_space<vmem>>, %arg6: memref<1x4x16xf32, #tpu.memory_space<vmem>>) attributes {dimension_semantics = [#tpu.dimension_semantics<parallel>], iteration_bounds = array<i64: 2>, scalar_prefetch = 0 : i64, scratch_operands = 0 : i64, tpu.core_type = #tpu.core_type<tc>, window_params = [{transform_indices = @transform_0, window_bounds = array<i64: 1, 4, 16>}, {pipeline_mode = #tpu.pipeline_mode<synchronous>, transform_indices = @transform_1, window_bounds = array<i64: 3, 32, 4>}, {pipeline_mode = #tpu.pipeline_mode<synchronous>, transform_indices = @transform_2, window_bounds = array<i64: 32, 1>}, {pipeline_mode = #tpu.pipeline_mode<synchronous>, transform_indices = @transform_3, window_bounds = array<i64: 3, 4, 32>}, {pipeline_mode = #tpu.pipeline_mode<synchronous>, transform_indices = @transform_4, window_bounds = array<i64: 4, 1>}, {transform_indices = @transform_5, window_bounds = array<i64: 1, 4, 16>}]} {
    %c0 = arith.constant 0 : index
    %c0_0 = arith.constant 0 : index
    %c0_1 = arith.constant 0 : index
    %0 = vector.load %arg1[%c0, %c0_0, %c0_1] : memref<1x4x16xf32, #tpu.memory_space<vmem>>, vector<1x4x16xf32>
    %1 = vector.shape_cast %0 : vector<1x4x16xf32> to vector<4x16xf32>
    %c0_2 = arith.constant 0 : index
    %c0_3 = arith.constant 0 : index
    %c0_4 = arith.constant 0 : index
    %2 = vector.load %arg2[%c0_2, %c0_3, %c0_4] : memref<3x32x4xf32, #tpu.memory_space<vmem>>, vector<1x32x4xf32>
    %3 = vector.shape_cast %2 : vector<1x32x4xf32> to vector<32x4xf32>
    %4 = vector.extract_strided_slice %1 {offsets = [0, 0], sizes = [4, 12], strides = [1, 1]} : vector<4x16xf32> to vector<4x12xf32>
    %cst = arith.constant dense<0.000000e+00> : vector<32x12xf32>
    %5 = tpu.matmul %3, %4, %cst {dimension_numbers = #tpu.dot_dimension_numbers<[1], [0], [0], [1], [0, 0, 1, 1], [], []>} : vector<32x4xf32>, vector<4x12xf32>, vector<32x12xf32> -> vector<32x12xf32>
    %c1 = arith.constant 1 : index
    %c0_5 = arith.constant 0 : index
    %c0_6 = arith.constant 0 : index
    %6 = vector.load %arg2[%c1, %c0_5, %c0_6] : memref<3x32x4xf32, #tpu.memory_space<vmem>>, vector<1x32x4xf32>
    %7 = vector.shape_cast %6 : vector<1x32x4xf32> to vector<32x4xf32>
    %8 = vector.extract_strided_slice %1 {offsets = [0, 2], sizes = [4, 12], strides = [1, 1]} : vector<4x16xf32> to vector<4x12xf32>
    %cst_7 = arith.constant dense<0.000000e+00> : vector<32x12xf32>
    %9 = tpu.matmul %7, %8, %cst_7 {dimension_numbers = #tpu.dot_dimension_numbers<[1], [0], [0], [1], [0, 0, 1, 1], [], []>} : vector<32x4xf32>, vector<4x12xf32>, vector<32x12xf32> -> vector<32x12xf32>
    %10 = arith.addf %5, %9 : vector<32x12xf32>
    %c2 = arith.constant 2 : index
    %c0_8 = arith.constant 0 : index
    %c0_9 = arith.constant 0 : index
    %11 = vector.load %arg2[%c2, %c0_8, %c0_9] : memref<3x32x4xf32, #tpu.memory_space<vmem>>, vector<1x32x4xf32>
    %12 = vector.shape_cast %11 : vector<1x32x4xf32> to vector<32x4xf32>
    %13 = vector.extract_strided_slice %1 {offsets = [0, 4], sizes = [4, 12], strides = [1, 1]} : vector<4x16xf32> to vector<4x12xf32>
    %cst_10 = arith.constant dense<0.000000e+00> : vector<32x12xf32>
    %14 = tpu.matmul %12, %13, %cst_10 {dimension_numbers = #tpu.dot_dimension_numbers<[1], [0], [0], [1], [0, 0, 1, 1], [], []>} : vector<32x4xf32>, vector<4x12xf32>, vector<32x12xf32> -> vector<32x12xf32>
    %15 = arith.addf %10, %14 : vector<32x12xf32>
    %c0_11 = arith.constant 0 : index
    %c0_12 = arith.constant 0 : index
    %16 = vector.load %arg3[%c0_11, %c0_12] : memref<32x1xf32, #tpu.memory_space<vmem>>, vector<32x1xf32>
    %17 = vector.broadcast %16 : vector<32x1xf32> to vector<32x12xf32>
    %18 = arith.addf %15, %17 : vector<32x12xf32>
    %cst_13 = arith.constant 0.000000e+00 : f32
    %19 = vector.broadcast %cst_13 : f32 to vector<32x12xf32>
    %20 = arith.maximumf %18, %19 : vector<32x12xf32>
    %c0_14 = arith.constant 0 : index
    %c0_15 = arith.constant 0 : index
    %c0_16 = arith.constant 0 : index
    %21 = vector.load %arg4[%c0_14, %c0_15, %c0_16] : memref<3x4x32xf32, #tpu.memory_space<vmem>>, vector<1x4x32xf32>
    %22 = vector.shape_cast %21 : vector<1x4x32xf32> to vector<4x32xf32>
    %23 = vector.extract_strided_slice %20 {offsets = [0, 0], sizes = [32, 8], strides = [1, 1]} : vector<32x12xf32> to vector<32x8xf32>
    %cst_17 = arith.constant dense<0.000000e+00> : vector<4x8xf32>
    %24 = tpu.matmul %22, %23, %cst_17 {dimension_numbers = #tpu.dot_dimension_numbers<[1], [0], [0], [1], [0, 0, 1, 1], [], []>} : vector<4x32xf32>, vector<32x8xf32>, vector<4x8xf32> -> vector<4x8xf32>
    %c1_18 = arith.constant 1 : index
    %c0_19 = arith.constant 0 : index
    %c0_20 = arith.constant 0 : index
    %25 = vector.load %arg4[%c1_18, %c0_19, %c0_20] : memref<3x4x32xf32, #tpu.memory_space<vmem>>, vector<1x4x32xf32>
    %26 = vector.shape_cast %25 : vector<1x4x32xf32> to vector<4x32xf32>
    %27 = vector.extract_strided_slice %20 {offsets = [0, 2], sizes = [32, 8], strides = [1, 1]} : vector<32x12xf32> to vector<32x8xf32>
    %cst_21 = arith.constant dense<0.000000e+00> : vector<4x8xf32>
    %28 = tpu.matmul %26, %27, %cst_21 {dimension_numbers = #tpu.dot_dimension_numbers<[1], [0], [0], [1], [0, 0, 1, 1], [], []>} : vector<4x32xf32>, vector<32x8xf32>, vector<4x8xf32> -> vector<4x8xf32>
    %29 = arith.addf %24, %28 : vector<4x8xf32>
    %c2_22 = arith.constant 2 : index
    %c0_23 = arith.constant 0 : index
    %c0_24 = arith.constant 0 : index
    %30 = vector.load %arg4[%c2_22, %c0_23, %c0_24] : memref<3x4x32xf32, #tpu.memory_space<vmem>>, vector<1x4x32xf32>
    %31 = vector.shape_cast %30 : vector<1x4x32xf32> to vector<4x32xf32>
    %32 = vector.extract_strided_slice %20 {offsets = [0, 4], sizes = [32, 8], strides = [1, 1]} : vector<32x12xf32> to vector<32x8xf32>
    %cst_25 = arith.constant dense<0.000000e+00> : vector<4x8xf32>
    %33 = tpu.matmul %31, %32, %cst_25 {dimension_numbers = #tpu.dot_dimension_numbers<[1], [0], [0], [1], [0, 0, 1, 1], [], []>} : vector<4x32xf32>, vector<32x8xf32>, vector<4x8xf32> -> vector<4x8xf32>
    %34 = arith.addf %29, %33 : vector<4x8xf32>
    %c0_26 = arith.constant 0 : index
    %c0_27 = arith.constant 0 : index
    %35 = vector.load %arg5[%c0_26, %c0_27] : memref<4x1xf32, #tpu.memory_space<vmem>>, vector<4x1xf32>
    %36 = vector.broadcast %35 : vector<4x1xf32> to vector<4x8xf32>
    %37 = arith.addf %34, %36 : vector<4x8xf32>
    %c0_28 = arith.constant 0 : index
    %c0_29 = arith.constant 0 : index
    %c0_30 = arith.constant 0 : index
    %38 = vector.load %arg6[%c0_28, %c0_29, %c0_30] : memref<1x4x16xf32, #tpu.memory_space<vmem>>, vector<1x4x8xf32>
    %39 = vector.shape_cast %38 : vector<1x4x8xf32> to vector<4x8xf32>
    %40 = vector.shape_cast %37 : vector<4x8xf32> to vector<1x4x8xf32>
    tpu.vector_store %arg6[%c0_28, %c0_29, %c0_30], %40 {strides = array<i32>} : memref<1x4x16xf32, #tpu.memory_space<vmem>>, vector<1x4x8xf32>,
    return
  }
  func.func @transform_0(%arg0: i32) -> (i32, i32, i32) {
    %c0_i32 = arith.constant 0 : i32
    %c0_i32_0 = arith.constant 0 : i32
    %c0_i32_1 = arith.constant 0 : i32
    return %arg0, %c0_i32, %c0_i32_0 : i32, i32, i32
  }
  func.func @transform_1(%arg0: i32) -> (i32, i32, i32) {
    %c0_i32 = arith.constant 0 : i32
    %c0_i32_0 = arith.constant 0 : i32
    %c0_i32_1 = arith.constant 0 : i32
    %c0_i32_2 = arith.constant 0 : i32
    return %c0_i32, %c0_i32_0, %c0_i32_1 : i32, i32, i32
  }
  func.func @transform_2(%arg0: i32) -> (i32, i32) {
    %c0_i32 = arith.constant 0 : i32
    %c0_i32_0 = arith.constant 0 : i32
    %c0_i32_1 = arith.constant 0 : i32
    return %c0_i32, %c0_i32_0 : i32, i32
  }
  func.func @transform_3(%arg0: i32) -> (i32, i32, i32) {
    %c0_i32 = arith.constant 0 : i32
    %c0_i32_0 = arith.constant 0 : i32
    %c0_i32_1 = arith.constant 0 : i32
    %c0_i32_2 = arith.constant 0 : i32
    return %c0_i32, %c0_i32_0, %c0_i32_1 : i32, i32, i32
  }
  func.func @transform_4(%arg0: i32) -> (i32, i32) {
    %c0_i32 = arith.constant 0 : i32
    %c0_i32_0 = arith.constant 0 : i32
    %c0_i32_1 = arith.constant 0 : i32
    return %c0_i32, %c0_i32_0 : i32, i32
  }
  func.func @transform_5(%arg0: i32) -> (i32, i32, i32) {
    %c0_i32 = arith.constant 0 : i32
    %c0_i32_0 = arith.constant 0 : i32
    %c0_i32_1 = arith.constant 0 : i32
    return %arg0, %c0_i32, %c0_i32_0 : i32, i32, i32
  }
}

</mosaic_0001>

<bundles_post_ra>
// kernel: tpu_custom_call.1
= control target key start
LH: loop header
LB: loop body
LE: loop exit
PB: predicated region body
PF: predicated region fallthrough
CT: control target
= control target key end

     0   :  { %10 = vsyncpa [#allocation3], 0  ;;  %s964_s0 = inlined_call_operand.vmem [shape: f32[2,4,16], index: 0, kind: input, shape index: {}]   ;;  %s965_s1 = inlined_call_operand.vmem [shape: f32[3,32,4], index: 1, kind: input, shape index: {}]   ;;  %s966_s2 = inlined_call_operand.vmem [shape: f32[32,1], index: 2, kind: input, shape index: {}]   ;;  %s967_s3 = inlined_call_operand.vmem [shape: f32[3,4,32], index: 3, kind: input, shape index: {}]   ;;  %s968_s4 = inlined_call_operand.vmem [shape: f32[4,1], index: 4, kind: input, shape index: {}]   ;;  %s969_s5 = inlined_call_operand.hbm [shape: f32[2,4,16], index: 5, kind: output, shape index: {}]  }
   0x1   :  { %12 = vsyncpa [#allocation3 + $0x1], 0  ;;  %s795_s18 = smov 0   ;;  %s797_s19 = smov 0  }
   0x2   :  { %s799_s20 = smov 0   ;;  %s801_s21 = smov 0  }
   0x3 LB: > { %s816_s22 = sadd.s32 4294967295, %s760_s21   ;;  %s595_s23 = sadd.s32 4294967294, %s760_s21   ;;  %s760_s21 = sphi %s801_s21, %s975_s21   ;;  %s756_s20 = sphi %s799_s20, %s974_s20   ;;  %s752_s19 = sphi %s797_s19, %s973_s19   ;;  %s748_s18 = sphi %s795_s18, %s972_s18  }
   0x4   : > { %s820_s24 = sadd.s32 1, %s760_s21   ;;  %s135_s25 = sadd.s32 1, %s756_s20 }
   0x5   : > { %s132_s26 = ssub.s32 %s760_s21, %s820_s24  ;;  %p145_p0 = scmp.ne.s32.totalorder %s756_s20, %s752_s19 }
   0x6   : > { %p133_p1 = scmp.eq.s32.totalorder %s132_s26, 0  ;;  %p146_p2 = scmp.eq.s32.totalorder %s816_s22, 1 }
   0x7   : > { %p151_p3 = scmp.ne.s32.totalorder %s752_s19, %s748_s18  ;;  %p152_p4 = scmp.eq.s32.totalorder %s595_s23, 1 }
   0x8   : > { %s831_s27 = scalar_select %p133_p1, %s756_s20, %s135_s25  }
   0x9   : > { %p833_p5 = por %p146_p2, %p145_p0  ;;  %p837_p6 = por %p152_p4, %p151_p3 }
   0xa   : > { %p598_p7 = scmp.ge.s32.totalorder %s760_s21, 1  ;;  %p189_p8 = scmp.lt.s32.totalorder %s760_s21, 3 }
   0xc   : > { %p190_p9 = pnand %p598_p7, %p189_p8 }
   0xd   : > { %p216_p10 = scmp.lt.s32.totalorder (!%p190_p9), %s816_s22, 1  ;;  %s762_s10 = smov (!%p190_p9), 124  }
   0xe   : > { %193 = sbr.rel (%p190_p9) target bundleno = 587 (0x24b), region = 40  ;;  %s763_s11 = smov (!%p190_p9), 126  }
   0xf   : > { %s630_s8 = sshll.u32 (!%p190_p9), %s816_s22, 2 }
  0x10   : > { %s531_s13 = scalar_lea.hbm (!%p190_p9), %s969_s5, %s630_s8 }
  0x11   : > { %s535_s16 = sshll.u32 (!%p190_p9), %s531_s13, 4  ;;  %s536_s16 = int_to_ptr.hbm [resolvable:$true] %s535_s16 }
  0x12   : > { %s712_s23 = sshra.s32 (!%p190_p9), %s536_s16, 4  ;;  %s713_s23 = int_to_ptr.hbm [resolvable:$true] %s712_s23 }
  0x13   : > { %s217_s30 = scalar_select %p216_p10, %s816_s22, 1  ;;  %vm246_vm0 = vcmask 1043456   ;;  %vm233_vm1 = vcmask 31744   ;;  %v221_v1 = vld [vmem:[%s965_s1] sm:$0xff]  ;;  %v222_v2 = vld [vmem:[%s965_s1 + $0x8] sm:$0xff]  ;;  %v223_v3 = vld [vmem:[%s965_s1 + $0x10] sm:$0xff] }
  0x14   : > { %v378_v4 = vld [vmem:[%s966_s2 + $0x18] sm:$0xff]  ;;  %v764_v5 = vmov 0   ;;  %v615_v6 = vld [vmem:[%s965_s1 + $0x40] sm:$0xff]  ;;  %v377_v9 = vld [vmem:[%s966_s2 + $0x10] sm:$0xff]  ;;  %vm426_vm2 = vcmask 261120   ;;  %vm518_vm3 = vcmask 60416   ;;  %p719_p0 = scmp.lt.s32.totalorder %s713_s23, %s969_s5 }
  0x15   : > { %s600_s6 = sshll.u32 %s217_s30, 2  ;;  %675 = vset.pattern.permute.xlu1 %v764_v5  ;;  %676 = vset.pattern.permute.xlu2 %v764_v5  ;;  %v224_v8 = vld [vmem:[%s965_s1 + $0x18] sm:$0xff]  ;;  %v376_v10 = vld [vmem:[%s966_s2 + $0x8] sm:$0xff]  ;;  %v601_v11 = vld [vmem:[%s965_s1 + $0x20] sm:$0xff]  ;;  %s714_s22 = scalar_lea.hbm %s713_s23, 4 }
  0x16   : > { %s219_s9 = scalar_lea.vmem %s964_s0, %s600_s6  ;;  %396 = vperm.xlu1 %675, %v378_v4   ;;  %697 = vset.pattern.permute.xlu0 %v764_v5  ;;  %v616_v12 = vld [vmem:[%s965_s1 + $0x48] sm:$0xff]  ;;  %v375_v14 = vld [vmem:[%s966_s2] sm:$0xff]  ;;  %v617_v16 = vld [vmem:[%s965_s1 + $0x50] sm:$0xff]  ;;  %s213_s6 = sand.u32 1, %s752_s19  }
  0x17   : > { %v220_v0 = vld [vmem:[%s219_s9] sm:$0xf]  ;;  %386 = vperm.xlu2 %676, %v376_v10   ;;  %v602_v15 = vld [vmem:[%s965_s1 + $0x28] sm:$0xff]  ;;  %v603_v17 = vld [vmem:[%s965_s1 + $0x30] sm:$0xff]  ;;  %s599_s7 = sshll.u32 %s213_s6, 2  ;;  %s521_s17 = scalar_lea.sflag [#allocation3], %s213_s6 }
  0x18   : > { %326 = vrot.lane.b32.xlu0 %v220_v0, %s762_s10  ;;  %610 = vmatpush.msk.msra.mxu1 %vm246_vm0, %v220_v0  ;;  %v618_v18 = vld [vmem:[%s965_s1 + $0x58] sm:$0xff]  ;;  %v511_v47 = vld [vmem:[%s968_s4] sm:$0xf]  ;;  %v624_v61 = vld [vmem:[%s967_s3 + $0x4] sm:$0xf]  ;;  %s215_s14 = scalar_lea.vmem [#allocation2], %s599_s7  ;;  %p715_p11 = scmp.ne.s32.totalorder %s713_s23, %s714_s22 }
  0x19   : > { %611 = vmatmul.msk.f32.vlgmr.msra.gmra.mxu1 %vm233_vm1, %v221_v1  ;;  %v604_v19 = vld [vmem:[%s965_s1 + $0x38] sm:$0xff]  ;;  %v627_v5 = vld [vmem:[%s967_s3 + $0x8] sm:$0xf]  ;;  %s533_s15 = sshll.u32 %s215_s14, 4  ;;  %s534_s15 = int_to_ptr.vmem [resolvable:$true] %s533_s15 }
  0x1a   : > { %p716_p12 = pnand %p715_p11, %p833_p5 }
  0x1c   : > { %p717_p13 = pneg %p716_p12 }
  0x1e   : > { %391 = vperm.xlu1 %675, %v377_v9  }
  0x1f   : > { %381 = vperm.xlu2 %676, %v375_v14  }
  0x20   : > { %231 = vrot.lane.b32.xlu0 %v220_v0, %s763_s11  ;;  %v407_v0 = vld [vmem:[%s967_s3] sm:$0xf] }
  0x21   : > { %612 = vmatmul.msk.f32.gmra.mxu1 %vm233_vm1, %v222_v2 }
  0x29   : > { %613 = vmatmul.msk.f32.gmra.mxu1 %vm233_vm1, %v223_v3 }
  0x31   : > { %614 = vmatmul.msk.f32.gmra.mxu1 %vm233_vm1, %v224_v8 }
  0x71   : > { %v387_v21 = vpop.permute.xlu2 %386 }
  0x79   : > { %v382_v28 = vpop.permute.xlu2 %381 }
  0x88   : > { %v397_v35 = vpop.permute.xlu1 %396 }
  0x8a   : > { %v327_v7 = vpop.permute.xlu0 %326 }
  0x8b   : > { %619 = vmatpush.msk.msra.mxu2 %vm246_vm0, %v327_v7 }
  0x8c   : > { %620 = vmatmul.msk.f32.vlgmr.msra.gmra.mxu2 %vm233_vm1, %v615_v6 }
  0x90   : > { %v392_v44 = vpop.permute.xlu1 %391 }
  0x92   : > { %v232_v13 = vpop.permute.xlu0 %231 }
  0x93   : > { %605 = vmatpush.msk.msra.mxu0 %vm246_vm0, %v232_v13 }
  0x94   : > { %606 = vmatmul.msk.f32.vlgmr.msra.gmra.mxu0 %vm233_vm1, %v601_v11  ;;  %621 = vmatmul.msk.f32.gmra.mxu2 %vm233_vm1, %v616_v12 }
  0x96   : > { %v309_v20 = vpop.f32.mrf.mxu1 }
  0x9c   : > { %607 = vmatmul.msk.f32.gmra.mxu0 %vm233_vm1, %v602_v15  ;;  %622 = vmatmul.msk.f32.gmra.mxu2 %vm233_vm1, %v617_v16 }
  0x9e   : > { %v312_v24 = vpop.f32.mrf.mxu1 }
  0xa4   : > { %608 = vmatmul.msk.f32.gmra.mxu0 %vm233_vm1, %v603_v17  ;;  %623 = vmatmul.msk.f32.gmra.mxu2 %vm233_vm1, %v618_v18 }
  0xa6   : > { %v315_v33 = vpop.f32.mrf.mxu1 }
  0xac   : > { %609 = vmatmul.msk.f32.gmra.mxu0 %vm233_vm1, %v604_v19 }
  0xae   : > { %v318_v42 = vpop.f32.mrf.mxu1 }
 0x10f   : > { %v359_v22 = vpop.f32.mrf.mxu2 }
 0x111   : > { %v266_v23 = vpop.f32.mrf.mxu0 }
 0x112   : > { %v310_v25 = vadd.f32 %v309_v20, %v266_v23 }
 0x114   : > { %v371_v27 = vadd.f32 %v359_v22, %v310_v25 }
 0x116   : > { %v399_v31 = vadd.f32 %v382_v28, %v371_v27 }
 0x117   : > { %v362_v26 = vpop.f32.mrf.mxu2 }
 0x118   : > { %v403_v37 = vmax.f32 %v399_v31, 0.0 }
 0x119   : > { %v269_v29 = vpop.f32.mrf.mxu0 }
 0x11a   : > { %v313_v30 = vadd.f32 %v312_v24, %v269_v29 }
 0x11c   : > { %v372_v32 = vadd.f32 %v362_v26, %v313_v30 }
 0x11e   : > { %v400_v34 = vadd.f32 %v387_v21, %v372_v32 }
 0x11f   : > { %v365_v36 = vpop.f32.mrf.mxu2 }
 0x120   : > { %v404_v38 = vmax.f32 %v400_v34, 0.0 }
 0x121   : > { %v272_v39 = vpop.f32.mrf.mxu0 }
 0x122   : > { %v682_v40 = vpack.i.bf16 %v403_v37, %v404_v38  ;;  %v316_v41 = vadd.f32 %v315_v33, %v272_v39 }
 0x124   : > { %683 = vrot.lane.b32.xlu1 %v682_v40, %s763_s11  ;;  %v373_v43 = vadd.f32 %v365_v36, %v316_v41 }
 0x126   : > { %v401_v49 = vadd.f32 %v392_v44, %v373_v43 }
 0x127   : > { %v368_v46 = vpop.f32.mrf.mxu2 }
 0x128   : > { %v405_v52 = vmax.f32 %v401_v49, 0.0 }
 0x129   : > { %v275_v45 = vpop.f32.mrf.mxu0 }
 0x12a   : > { %v319_v48 = vadd.f32 %v318_v42, %v275_v45 }
 0x12c   : > { %v374_v50 = vadd.f32 %v368_v46, %v319_v48  ;;  %514 = vperm.xlu1 %675, %v511_v47  }
 0x12e   : > { %v402_v51 = vadd.f32 %v397_v35, %v374_v50 }
 0x130   : > { %v406_v53 = vmax.f32 %v402_v51, 0.0 }
 0x132   : > { %v687_v54 = vpack.i.bf16 %v405_v52, %v406_v53 }
 0x134   : > { %688 = vrot.lane.b32.xlu2 %v687_v54, %s762_s10  ;;  %678 = vrot.lane.b32.xlu0 %v687_v54, %s763_s11  ;;  %s718_s11 = scalar_lea.hbm %s969_s5, 8 }
 0x135   : > { %p720_p1 = scmp.lt.s32.totalorder %s718_s11, %s714_s22 }
 0x137   : > { %p721_p2 = por %p720_p1, %p719_p0 }
 0x139   : > { %p722_p3 = pnand %p721_p2, %p717_p13 }
 0x13c   : > { %693 = vrot.lane.b32.xlu0 %v682_v40, %s762_s10 }
 0x18e   : > { %v689_v62 = vpop.permute.xlu2 %688 }
 0x18f   : > { %v690_v63 = vunpack.i.l.bf16 %v689_v62  ;;  %v691_v2 = vunpack.i.h.bf16 %v689_v62 }
 0x196   : > { %v684_v57 = vpop.permute.xlu1 %683 }
 0x197   : > { %v685_v59 = vunpack.i.l.bf16 %v684_v57  ;;  %v686_v60 = vunpack.i.h.bf16 %v684_v57 }
 0x19e   : > { %v515_v11 = vpop.permute.xlu1 %514 }
 0x1a6   : > { %v679_v55 = vpop.permute.xlu0 %678 }
 0x1a7   : > { %v680_v56 = vunpack.i.l.bf16 %v679_v55  ;;  %v681_v58 = vunpack.i.h.bf16 %v679_v55 }
 0x1a9   : > { %442 = vmatpush.msra.mxu3 %v680_v56 }
 0x1ab   : > { %443 = vmatpush.msra.mxu3 %v681_v58 }
 0x1ad   : > { %444 = vmatpush.msra.mxu3 %v685_v59 }
 0x1ae   : > { %v694_v1 = vpop.permute.xlu0 %693 }
 0x1af   : > { %445 = vmatpush.msra.mxu3 %v686_v60  ;;  %v695_v3 = vunpack.i.l.bf16 %v694_v1  ;;  %v696_v4 = vunpack.i.h.bf16 %v694_v1 }
 0x1b0   : > { %625 = vmatmul.msk.f32.vlgmr.msra.gmra.mxu3 %vm426_vm2, %v624_v61 }
 0x1b1   : > { %465 = vmatpush.msrb.mxu3 %v406_v53 }
 0x1b3   : > { %466 = vmatpush.msrb.mxu3 %v405_v52 }
 0x1b5   : > { %467 = vmatpush.msrb.mxu3 %v404_v38 }
 0x1b7   : > { %468 = vmatpush.msrb.mxu3 %v403_v37 }
 0x1b8   : > { %626 = vmatmul.msk.f32.vlgmr.msrb.gmra.mxu3 %vm426_vm2, %v407_v0 }
 0x1b9   : > { %502 = vmatpush.msra.mxu3 %v690_v63 }
 0x1bb   : > { %503 = vmatpush.msra.mxu3 %v691_v2 }
 0x1bd   : > { %504 = vmatpush.msra.mxu3 %v695_v3 }
 0x1bf   : > { %505 = vmatpush.msra.mxu3 %v696_v4 }
 0x1c0   : > { %628 = vmatmul.msk.f32.vlgmr.msra.gmra.mxu3 %vm426_vm2, %v627_v5 }
 0x233   : > { %v447_v6 = vpop.f32.mrf.mxu3 }
 0x23b   : > { %v470_v7 = vpop.f32.mrf.mxu3 }
 0x23c   : > { %v471_v8 = vadd.f32 %v470_v7, %v447_v6 }
 0x243   : > { %v507_v9 = vpop.f32.mrf.mxu3 }
 0x244   : > { %v510_v10 = vadd.f32 %v507_v9, %v471_v8 }
 0x246   : > { %v517_v12 = vadd.f32 %v515_v11, %v510_v10 }
 0x248   : > { %519 = vst.msk [vmem:[%s215_s14] sm:$0xf] %vm518_vm3, %v517_v12 }
 0x249   : > { %725 = shalt.err (!%p722_p3)
}
 0x24a   : > { %633 = dma.vmem_to_hbm [thread:$0]  (%p833_p5), %s534_s15, 64, %s536_s16, %s521_s17  }
 0x24b PF: > { %p639_p4 = scmp.ge.s32.totalorder %s760_s21, 2  ;;  %s547_s6 = sand.u32 1, %s748_s18  }
 0x24c   : > { %s548_s7 = scalar_lea.sflag [#allocation3], %s547_s6 }
 0x24d   : > { %p636_p7 = pnand %p639_p4, %p837_p6 }
 0x24f   : > { %p637_p8 = pneg %p636_p7 }
 0x251   : > { %743 = dma.done.wait (%p637_p8), %s548_s7, 64  }
 0x252   : > { %745 = vsyncadd (%p637_p8), %s548_s7, 4294967232  ;;  %p15_p9 = scmp.ge.s32.totalorder %s820_s24, 4   ;;  %s972_s18 = smov %s752_s19 }
 0x253   : > { %s973_s19 = smov %s756_s20  ;;  %s974_s20 = smov %s831_s27 }
 0x254   : > { %s975_s21 = smov %s820_s24  ;;  %17 = sbr.rel (!%p15_p9) target bundleno = 3 (0x3), region = 79 }
 0x259   :  { %554 = vsyncpa [#allocation3], 1 }
 0x25a   :  { %556 = vsyncpa [#allocation3 + $0x1], 1 }

</bundles_post_ra>
